<compile_context>
chip_gen: v6e
topology: v6e:2x2x1
jax: 0.10.0
libtpu: 0.0.40
codegen_flags: <defaults>
</compile_context>

<pallas_src>
import math

import jax
import jax.numpy as jnp
from jax.experimental import pallas as pl
from jax.experimental.pallas import tpu as pltpu

_ALPHA = math.sqrt(2.0 / math.pi)


def _gelu_kernel(x_ref, o_ref):
    # Match PyTorch reference: compute in float32, cast back to input dtype.
    x = x_ref[...].astype(jnp.float32)
    y = 0.5 * x * (1.0 + jnp.tanh(_ALPHA * (x + 0.044715 * (x * x * x))))
    o_ref[...] = y.astype(o_ref.dtype)


def gelu_pallas(x: jax.Array, *, lane_cols: int = 512,
                target_block_bytes: int = 2 << 20) -> jax.Array:
    """Tanh-approximation GELU, computed in a Pallas TPU kernel.

    The input is flattened to a lane-dense (rows, lane_cols) slab (lane_cols a
    multiple of 128), tiled along rows into ~2 MiB blocks, and restored to the
    original shape afterwards.
    """
    orig_shape = x.shape
    orig_dtype = x.dtype
    n = x.size
    if n == 0:
        return x

    itemsize = jnp.dtype(orig_dtype).itemsize
    # Sublane packing multiple: 8 for f32, 16 for bf16, 32 for 8-bit dtypes.
    sub = max(8, 32 // max(1, itemsize))

    # Rows of the lane-dense (rows, lane_cols) slab.
    rows = -(-n // lane_cols)

    # Row tile sized for ~target_block_bytes per block per array.
    tm = max(sub, (target_block_bytes // itemsize) // lane_cols)
    tm = (tm // sub) * sub

    if rows <= tm:
        # Small input: one block, padded up to the sublane multiple.
        padded_rows = -(-rows // sub) * sub
        tm = padded_rows
    else:
        # Multi-step pipelined grid; pad rows so the grid divides evenly
        # (padding is zeros; gelu(0) == 0 and is sliced off afterwards).
        padded_rows = -(-rows // tm) * tm

    grid = (padded_rows // tm,)

    padded_n = padded_rows * lane_cols
    x_flat = x.reshape(-1)
    if padded_n != n:
        x_flat = jnp.pad(x_flat, (0, padded_n - n))
    x2 = x_flat.reshape(padded_rows, lane_cols)

    block_bytes = tm * lane_cols * itemsize
    # 2 arrays (in + out) x double buffering, plus headroom; clamp to sane range.
    vmem_limit = min(64 << 20, max(16 << 20, 4 * block_bytes + (4 << 20)))

    out2 = pl.pallas_call(
        _gelu_kernel,
        out_shape=jax.ShapeDtypeStruct((padded_rows, lane_cols), orig_dtype),
        grid_spec=pltpu.PrefetchScalarGridSpec(
            num_scalar_prefetch=0,
            grid=grid,
            in_specs=[pl.BlockSpec((tm, lane_cols), lambda i: (i, 0))],
            out_specs=pl.BlockSpec((tm, lane_cols), lambda i: (i, 0)),
        ),
        compiler_params=pltpu.CompilerParams(
            dimension_semantics=("parallel",),
            vmem_limit_bytes=vmem_limit,
        ),
    )(x2)

    out_flat = out2.reshape(-1)
    if padded_n != n:
        out_flat = out_flat[:n]
    return out_flat.reshape(orig_shape)


def _gelu_ref(x):
    xf = x.astype(jnp.float32)
    y = 0.5 * xf * (1.0 + jnp.tanh(_ALPHA * (xf + 0.044715 * jnp.power(xf, 3.0))))
    return y.astype(x.dtype)


if __name__ == "__main__":
    key = jax.random.PRNGKey(0)

    # Small NCHW-like input consistent with the module (pure elementwise op).
    x = jax.random.normal(key, (2, 4, 16, 16), dtype=jnp.float32)
    out = gelu_pallas(x)
    jax.block_until_ready(out)
    ref = _gelu_ref(x)
    assert out.shape == x.shape and out.dtype == x.dtype
    assert jnp.allclose(out, ref, atol=1e-5, rtol=1e-5)

    # bf16 input (dtype round-trip path of the reference; larger row tile).
    xb = x.astype(jnp.bfloat16)
    outb = gelu_pallas(xb)
    jax.block_until_ready(outb)
    assert outb.dtype == jnp.bfloat16
    assert jnp.allclose(outb.astype(jnp.float32), _gelu_ref(xb).astype(jnp.float32),
                        atol=1e-2, rtol=1e-2)

    # Ragged shape exercising the zero-pad path.
    k2, k3 = jax.random.split(jax.random.PRNGKey(0))
    xr = jax.random.normal(k2, (3, 5, 7), dtype=jnp.float32)
    outr = gelu_pallas(xr)
    jax.block_until_ready(outr)
    assert jnp.allclose(outr, _gelu_ref(xr), atol=1e-5, rtol=1e-5)

    # Shape large enough to exercise the multi-step (pipelined, parallel) grid.
    xl = jax.random.normal(k3, (4, 512, 512), dtype=jnp.float32)
    outl = gelu_pallas(xl)
    jax.block_until_ready(outl)
    assert jnp.allclose(outl, _gelu_ref(xl), atol=1e-5, rtol=1e-5)

    print("KERNEL_OK")
</pallas_src>

<mosaic_0001>
module attributes {stable_mosaic.version = 11 : i64} {
  func.func @_gelu_kernel(%arg0: i32, %arg1: memref<8x512xf32, #tpu.memory_space<vmem>>, %arg2: memref<8x512xf32, #tpu.memory_space<vmem>>) attributes {dimension_semantics = [#tpu.dimension_semantics<parallel>], iteration_bounds = array<i64: 1>, scalar_prefetch = 0 : i64, scratch_operands = 0 : i64, tpu.core_type = #tpu.core_type<tc>, window_params = [{transform_indices = @transform_0, window_bounds = array<i64: 8, 512>}, {transform_indices = @transform_1, window_bounds = array<i64: 8, 512>}]} {
    %c0 = arith.constant 0 : index
    %c0_0 = arith.constant 0 : index
    %0 = vector.load %arg1[%c0, %c0_0] : memref<8x512xf32, #tpu.memory_space<vmem>>, vector<8x512xf32>
    %cst = arith.constant 5.000000e-01 : f32
    %1 = vector.broadcast %cst : f32 to vector<8x512xf32>
    %2 = arith.mulf %1, %0 : vector<8x512xf32>
    %3 = arith.mulf %0, %0 : vector<8x512xf32>
    %4 = arith.mulf %3, %0 : vector<8x512xf32>
    %cst_1 = arith.constant 4.471500e-02 : f32
    %5 = vector.broadcast %cst_1 : f32 to vector<8x512xf32>
    %6 = arith.mulf %5, %4 : vector<8x512xf32>
    %7 = arith.addf %0, %6 : vector<8x512xf32>
    %cst_2 = arith.constant 0.797884583 : f32
    %8 = vector.broadcast %cst_2 : f32 to vector<8x512xf32>
    %9 = arith.mulf %8, %7 : vector<8x512xf32>
    %10 = math.tanh %9 : vector<8x512xf32>
    %cst_3 = arith.constant 1.000000e+00 : f32
    %11 = vector.broadcast %cst_3 : f32 to vector<8x512xf32>
    %12 = arith.addf %11, %10 : vector<8x512xf32>
    %13 = arith.mulf %2, %12 : vector<8x512xf32>
    %c0_4 = arith.constant 0 : index
    %c0_5 = arith.constant 0 : index
    %14 = vector.load %arg2[%c0_4, %c0_5] : memref<8x512xf32, #tpu.memory_space<vmem>>, vector<8x512xf32>
    tpu.vector_store %arg2[%c0_4, %c0_5], %13 {strides = array<i32>} : memref<8x512xf32, #tpu.memory_space<vmem>>, vector<8x512xf32>,
    return
  }
  func.func @transform_0(%arg0: i32) -> (i32, i32) {
    %c0_i32 = arith.constant 0 : i32
    %c0_i32_0 = arith.constant 0 : i32
    return %arg0, %c0_i32 : i32, i32
  }
  func.func @transform_1(%arg0: i32) -> (i32, i32) {
    %c0_i32 = arith.constant 0 : i32
    %c0_i32_0 = arith.constant 0 : i32
    return %arg0, %c0_i32 : i32, i32
  }
}

</mosaic_0001>

<bundles_post_ra>
// kernel: tpu_custom_call.1
= control target key start
LH: loop header
LB: loop body
LE: loop exit
PB: predicated region body
PF: predicated region fallthrough
CT: control target
= control target key end

     0   :  { %6 = vsyncpa [#allocation3], 0  ;;  %s152_s0 = inlined_call_operand.hbm [shape: f32[8,512], index: 0, kind: input, shape index: {}]   ;;  %s153_s1 = inlined_call_operand.hbm [shape: f32[8,512], index: 1, kind: output, shape index: {}]  }
   0x1   :  { %7 = vsyncpa [#allocation4], 0  ;;  %s134_s6 = smov [#allocation2]  }
   0x2   :  { %s14_s7 = sshll.u32 %s134_s6, 4  ;;  %s15_s7 = int_to_ptr.vmem [resolvable:$true] %s14_s7 }
   0x3   :  { %s98_s8 = scalar_lea.vmem %s15_s7, 512  ;;  %p103_p1 = scmp.lt.s32.totalorder %s15_s7, %s15_s7 }
   0x4   :  { %p99_p0 = scmp.ne.s32.totalorder %s15_s7, %s98_s8  ;;  %p104_p2 = scmp.lt.s32.totalorder %s98_s8, %s98_s8 }
   0x6   :  { %p105_p3 = por %p104_p2, %p103_p1 }
   0x8   :  { %p106_p4 = pnand %p105_p3, %p99_p0 }
   0xa   :  { %109 = shalt.err (!%p106_p4)
}
   0xb   :  { %17 = dma.hbm_to_vmem [thread:$0]  %s152_s0, 512, %s15_s7, [#allocation3]  }
   0xc   :  { %130 = dma.done.wait [#allocation3], 512  }
   0xd   :  { %131 = vsyncadd [#allocation3], 4294966784  ;;  %v21_v0 = vld [vmem:[#allocation2] sm:$0xff]  ;;  %v22_v1 = vld [vmem:[#allocation2 + $0x8] sm:$0xff]  ;;  %s135_s0 = smov [#allocation5]  }
   0xe   :  { %v23_v2 = vld [vmem:[#allocation2 + $0x10] sm:$0xff]  ;;  %v29_v3 = vmul.f32 %v21_v0, %v21_v0  ;;  %v30_v4 = vmul.f32 %v22_v1, %v22_v1  ;;  %v24_v5 = vld [vmem:[#allocation2 + $0x18] sm:$0xff]  ;;  %v25_v24 = vmul.f32 0.5, %v21_v0  ;;  %v26_v26 = vmul.f32 0.5, %v22_v1  ;;  %s71_s11 = sshll.u32 %s135_s0, 4  ;;  %s72_s11 = int_to_ptr.vmem [resolvable:$true] %s71_s11 }
   0xf   :  { %v31_v6 = vmul.f32 %v23_v2, %v23_v2  ;;  %v32_v7 = vmul.f32 %v24_v5, %v24_v5  ;;  %v27_v29 = vmul.f32 0.5, %v23_v2  ;;  %v28_v32 = vmul.f32 0.5, %v24_v5  ;;  %s110_s12 = scalar_lea.vmem %s72_s11, 512  ;;  %p115_p6 = scmp.lt.s32.totalorder %s72_s11, %s72_s11 }
  0x10   :  { %v33_v8 = vmul.f32 %v29_v3, %v21_v0  ;;  %v34_v9 = vmul.f32 %v30_v4, %v22_v1  ;;  %p111_p5 = scmp.ne.s32.totalorder %s72_s11, %s110_s12  ;;  %p116_p7 = scmp.lt.s32.totalorder %s110_s12, %s110_s12 }
  0x11   :  { %v35_v10 = vmul.f32 %v31_v6, %v23_v2  ;;  %v36_v11 = vmul.f32 %v32_v7, %v24_v5 }
  0x12   :  { %v37_v12 = vmul.f32 0.044715, %v33_v8  ;;  %v38_v13 = vmul.f32 0.044715, %v34_v9  ;;  %p117_p8 = por %p116_p7, %p115_p6 }
  0x13   :  { %v39_v14 = vmul.f32 0.044715, %v35_v10  ;;  %v40_v15 = vmul.f32 0.044715, %v36_v11 }
  0x14   :  { %v41_v16 = vadd.f32 %v37_v12, %v21_v0  ;;  %v42_v17 = vadd.f32 %v38_v13, %v22_v1  ;;  %p118_p9 = pnand %p117_p8, %p111_p5 }
  0x15   :  { %v43_v18 = vadd.f32 %v39_v14, %v23_v2  ;;  %v44_v19 = vadd.f32 %v40_v15, %v24_v5 }
  0x16   :  { %v45_v20 = vmul.f32 0.7978846, %v41_v16  ;;  %v46_v21 = vmul.f32 0.7978846, %v42_v17 }
  0x17   :  { %v47_v22 = vmul.f32 0.7978846, %v43_v18  ;;  %v48_v23 = vmul.f32 0.7978846, %v44_v19 }
  0x18   :  { %82 = vtanh.f32 %v45_v20 }
  0x19   :  { %84 = vtanh.f32 %v46_v21 }
  0x1a   :  { %86 = vtanh.f32 %v47_v22 }
  0x1b   :  { %88 = vtanh.f32 %v48_v23 }
  0x25   :  { %v83_v25 = vpop.eup %82 }
  0x26   :  { %v85_v27 = vpop.eup %84  ;;  %v53_v28 = vadd.f32 1.0, %v83_v25 }
  0x27   :  { %v87_v30 = vpop.eup %86  ;;  %v54_v31 = vadd.f32 1.0, %v85_v27 }
  0x28   :  { %v89_v33 = vpop.eup %88  ;;  %v57_v34 = vmul.f32 %v53_v28, %v25_v24  ;;  %v55_v35 = vadd.f32 1.0, %v87_v30 }
  0x29   :  { %v58_v36 = vmul.f32 %v54_v31, %v26_v26  ;;  %v56_v37 = vadd.f32 1.0, %v89_v33 }
  0x2a   :  { %61 = vst [vmem:[#allocation5] sm:$0xff] %v57_v34  ;;  %v59_v38 = vmul.f32 %v55_v35, %v27_v29 }
  0x2b   :  { %62 = vst [vmem:[#allocation5 + $0x8] sm:$0xff] %v58_v36  ;;  %v60_v39 = vmul.f32 %v56_v37, %v28_v32 }
  0x2c   :  { %63 = vst [vmem:[#allocation5 + $0x10] sm:$0xff] %v59_v38 }
  0x2d   :  { %64 = vst [vmem:[#allocation5 + $0x18] sm:$0xff] %v60_v39 }
  0x2e   :  { %121 = shalt.err (!%p118_p9)
}
  0x2f   :  { %74 = dma.vmem_to_hbm [thread:$0]  %s72_s11, 512, %s153_s1, [#allocation4]  }
  0x30   :  { %132 = dma.done.wait [#allocation4], 512  }
  0x31   :  { %133 = vsyncadd [#allocation4], 4294966784 }
  0x32   :  { %78 = vsyncpa [#allocation3], 1 }
  0x33   :  { %79 = vsyncpa [#allocation4], 1 }

</bundles_post_ra>
